<compile_context>
chip_gen: v7x
topology: tpu7x:2x2x1
jax: 0.10.0
libtpu: 0.0.40
codegen_flags: <defaults>
</compile_context>

<pallas_src>
import jax
import jax.numpy as jnp
from jax.experimental import pallas as pl
from jax.experimental.pallas import tpu as pltpu


def camada_neural(components, components_weights, use_entropy, a_variables):
    """Lane-dense CamadaNeural forward.

    components         : [n, C, B] class-probability vectors (f32 or bf16),
                         classes on sublanes, batch on lanes (B ideally a
                         multiple of 128, C a multiple of the sublane pack).
    components_weights : [n] f32
    use_entropy        : static Python sequence of 0/1 flags (constructor arg
                         in the original module, so trace-time constant).
    a_variables        : [sum(use_entropy)] f32
    Returns f32[C, B]  (lane-dense; transpose outside only if the consumer
                        really needs [B, C]).
    """
    n, C, B = components.shape
    flags = tuple(int(round(float(u))) for u in use_entropy)
    assert len(flags) == n
    assert a_variables.shape[0] >= sum(flags), "a_variables too small for use_entropy"

    # Trace-time glue: replicate the module's running self.j counter and fold
    # the per-component scaling into two SMEM scalars:
    #   scale_i = base_i + ecoef_i * (1 / mean-entropy_i)
    # with base_i = w_i*a_j, ecoef_i = a_j   if use_entropy[i]
    #      base_i = w_i,     ecoef_i = 0     otherwise (entropy block not emitted).
    w = components_weights.astype(jnp.float32)
    a = a_variables.astype(jnp.float32)
    base_list, ecoef_list = [], []
    j = 0
    for i in range(n):
        if flags[i] == 1:
            base_list.append(w[i] * a[j])
            ecoef_list.append(a[j])
            j += 1
        else:
            base_list.append(w[i])
            ecoef_list.append(jnp.zeros((), jnp.float32))
    base = jnp.stack(base_list)     # f32[n]  (SMEM)
    ecoef = jnp.stack(ecoef_list)   # f32[n]  (SMEM)

    def kernel(base_ref, ecoef_ref, comp_ref, out_ref):
        # Single grid step; statically unrolled component loop, vreg-resident
        # f32 accumulator, one lane-dense store at the end.
        acc = jnp.zeros((C, B), jnp.float32)
        for i in range(n):
            p = comp_ref[i].astype(jnp.float32)                       # (C, B)
            if flags[i] == 1:
                # Entropy of Categorical(probs=p) per sample via
                #   H = log(psum) - sum(p*log p)/psum   (no full-tile divide)
                logp = jnp.log(jnp.maximum(p, 1e-30))                  # EUP
                psum = jnp.sum(p, axis=0, keepdims=True)               # (1, B) sublane adds
                s = jnp.sum(p * logp, axis=0, keepdims=True)           # (1, B)
                ent = jnp.log(psum) - s * pl.reciprocal(psum, approx=True)
                mean_ent = jnp.mean(ent, axis=1, keepdims=True)        # (1, 1) lane reduce
                inv_ent = 1.0 / mean_ent                               # exact: scalar cost
                scale = base_ref[i] + ecoef_ref[i] * inv_ent           # (1, 1)
            else:
                scale = base_ref[i]                                    # SMEM scalar
            acc = acc + scale * p
        out_ref[...] = acc

    return pl.pallas_call(
        kernel,
        out_shape=jax.ShapeDtypeStruct((C, B), jnp.float32),
        in_specs=[
            pl.BlockSpec(memory_space=pltpu.MemorySpace.SMEM),   # base  f32[n]
            pl.BlockSpec(memory_space=pltpu.MemorySpace.SMEM),   # ecoef f32[n]
            pl.BlockSpec(memory_space=pltpu.MemorySpace.VMEM),   # components [n, C, B]
        ],
        out_specs=pl.BlockSpec(memory_space=pltpu.MemorySpace.VMEM),
    )(base, ecoef, components)


def camada_neural_ref(components, components_weights, use_entropy, a_variables):
    """Pure-JAX reference on the same lane-dense [n, C, B] layout (exact math)."""
    n = components.shape[0]
    out = jnp.zeros(components.shape[1:], jnp.float32)
    j = 0
    for i in range(n):
        p = components[i].astype(jnp.float32)
        pn = p / jnp.sum(p, axis=0, keepdims=True)
        ent = -jnp.sum(pn * jnp.log(jnp.maximum(pn, 1e-30)), axis=0)   # (B,)
        inv_ent = 1.0 / jnp.mean(ent)
        if int(round(float(use_entropy[i]))) == 1:
            out = out + (components_weights[i] + inv_ent) * a_variables[j] * p
            j += 1
        else:
            out = out + components_weights[i] * p
    return out


if __name__ == "__main__":
    key = jax.random.PRNGKey(0)

    n_components = 3
    batch = 128          # maps to the 128-lane axis (unmasked lane-dense stores)
    n_classes = 16       # bf16 sublane pack of 16 -> no padding waste

    components_weights = jnp.array([0.5, 0.3, 0.2], dtype=jnp.float32)
    use_entropy = (1, 0, 1)                               # static, as in the module ctor
    a_variables = jnp.ones((sum(use_entropy),), dtype=jnp.float32)

    # Components are class-probability distributions (softmax outputs), built
    # directly in the lane-dense [n, C, B] layout and streamed as bf16.
    logits = jax.random.normal(key, (n_components, n_classes, batch), dtype=jnp.float32)
    components = jax.nn.softmax(logits, axis=1).astype(jnp.bfloat16)   # [n, C, B]

    out = camada_neural(components, components_weights, use_entropy, a_variables)
    out = jax.block_until_ready(out)                                   # [C, B]

    ref = camada_neural_ref(components, components_weights, use_entropy, a_variables)

    assert out.shape == (n_classes, batch)
    # Tolerance accounts for the approx EUP reciprocal on psum used in-kernel.
    assert jnp.allclose(out, ref, rtol=5e-3, atol=5e-3), "mismatch vs reference"

    print("KERNEL_OK")
</pallas_src>

<mosaic_0001>
module attributes {stable_mosaic.version = 11 : i64} {
  func.func @kernel(%arg0: memref<3xf32, #tpu.memory_space<smem>>, %arg1: memref<3xf32, #tpu.memory_space<smem>>, %arg2: memref<3x16x128xbf16, #tpu.memory_space<vmem>>, %arg3: memref<16x128xf32, #tpu.memory_space<vmem>>) attributes {dimension_semantics = [], scalar_prefetch = 0 : i64, scratch_operands = 0 : i64, tpu.core_type = #tpu.core_type<tc>} {
    %cst = arith.constant 0.000000e+00 : f32
    %0 = vector.broadcast %cst : f32 to vector<16x128xf32>
    %c0 = arith.constant 0 : index
    %c0_0 = arith.constant 0 : index
    %c0_1 = arith.constant 0 : index
    %1 = vector.load %arg2[%c0, %c0_0, %c0_1] : memref<3x16x128xbf16, #tpu.memory_space<vmem>>, vector<1x16x128xbf16>
    %2 = vector.shape_cast %1 : vector<1x16x128xbf16> to vector<16x128xbf16>
    %3 = arith.extf %2 : vector<16x128xbf16> to vector<16x128xf32>
    %cst_2 = arith.constant 1.000000e-30 : f32
    %4 = vector.broadcast %cst_2 : f32 to vector<16x128xf32>
    %5 = arith.maximumf %3, %4 : vector<16x128xf32>
    %6 = math.log %5 : vector<16x128xf32>
    %cst_3 = arith.constant dense<0.000000e+00> : vector<128xf32>
    %7 = vector.multi_reduction <add>, %3, %cst_3 [0] : vector<16x128xf32> to vector<128xf32>
    %8 = vector.shape_cast %7 : vector<128xf32> to vector<1x128xf32>
    %9 = arith.mulf %3, %6 : vector<16x128xf32>
    %cst_4 = arith.constant dense<0.000000e+00> : vector<128xf32>
    %10 = vector.multi_reduction <add>, %9, %cst_4 [0] : vector<16x128xf32> to vector<128xf32>
    %11 = vector.shape_cast %10 : vector<128xf32> to vector<1x128xf32>
    %12 = math.log %8 : vector<1x128xf32>
    %13 = tpu.reciprocal %8 {approx = true} : vector<1x128xf32> -> vector<1x128xf32>
    %14 = arith.mulf %11, %13 : vector<1x128xf32>
    %15 = arith.subf %12, %14 : vector<1x128xf32>
    %cst_5 = arith.constant dense<0.000000e+00> : vector<1xf32>
    %16 = vector.multi_reduction <add>, %15, %cst_5 [1] : vector<1x128xf32> to vector<1xf32>
    %17 = vector.shape_cast %16 : vector<1xf32> to vector<1x1xf32>
    %cst_6 = arith.constant 1.280000e+02 : f32
    %18 = vector.broadcast %cst_6 : f32 to vector<1x1xf32>
    %19 = arith.divf %17, %18 : vector<1x1xf32>
    %cst_7 = arith.constant 1.000000e+00 : f32
    %20 = vector.broadcast %cst_7 : f32 to vector<1x1xf32>
    %21 = arith.divf %20, %19 : vector<1x1xf32>
    %c0_8 = arith.constant 0 : index
    %22 = memref.load %arg0[%c0_8] : memref<3xf32, #tpu.memory_space<smem>>
    %c0_9 = arith.constant 0 : index
    %23 = memref.load %arg1[%c0_9] : memref<3xf32, #tpu.memory_space<smem>>
    %24 = vector.broadcast %23 : f32 to vector<1x1xf32>
    %25 = arith.mulf %24, %21 : vector<1x1xf32>
    %26 = vector.broadcast %22 : f32 to vector<1x1xf32>
    %27 = arith.addf %26, %25 : vector<1x1xf32>
    %28 = vector.broadcast %27 : vector<1x1xf32> to vector<16x128xf32>
    %29 = arith.mulf %28, %3 : vector<16x128xf32>
    %30 = arith.addf %0, %29 : vector<16x128xf32>
    %c1 = arith.constant 1 : index
    %c0_10 = arith.constant 0 : index
    %c0_11 = arith.constant 0 : index
    %31 = vector.load %arg2[%c1, %c0_10, %c0_11] : memref<3x16x128xbf16, #tpu.memory_space<vmem>>, vector<1x16x128xbf16>
    %32 = vector.shape_cast %31 : vector<1x16x128xbf16> to vector<16x128xbf16>
    %33 = arith.extf %32 : vector<16x128xbf16> to vector<16x128xf32>
    %c1_12 = arith.constant 1 : index
    %34 = memref.load %arg0[%c1_12] : memref<3xf32, #tpu.memory_space<smem>>
    %35 = vector.broadcast %34 : f32 to vector<16x128xf32>
    %36 = arith.mulf %35, %33 : vector<16x128xf32>
    %37 = arith.addf %30, %36 : vector<16x128xf32>
    %c2 = arith.constant 2 : index
    %c0_13 = arith.constant 0 : index
    %c0_14 = arith.constant 0 : index
    %38 = vector.load %arg2[%c2, %c0_13, %c0_14] : memref<3x16x128xbf16, #tpu.memory_space<vmem>>, vector<1x16x128xbf16>
    %39 = vector.shape_cast %38 : vector<1x16x128xbf16> to vector<16x128xbf16>
    %40 = arith.extf %39 : vector<16x128xbf16> to vector<16x128xf32>
    %cst_15 = arith.constant 1.000000e-30 : f32
    %41 = vector.broadcast %cst_15 : f32 to vector<16x128xf32>
    %42 = arith.maximumf %40, %41 : vector<16x128xf32>
    %43 = math.log %42 : vector<16x128xf32>
    %cst_16 = arith.constant dense<0.000000e+00> : vector<128xf32>
    %44 = vector.multi_reduction <add>, %40, %cst_16 [0] : vector<16x128xf32> to vector<128xf32>
    %45 = vector.shape_cast %44 : vector<128xf32> to vector<1x128xf32>
    %46 = arith.mulf %40, %43 : vector<16x128xf32>
    %cst_17 = arith.constant dense<0.000000e+00> : vector<128xf32>
    %47 = vector.multi_reduction <add>, %46, %cst_17 [0] : vector<16x128xf32> to vector<128xf32>
    %48 = vector.shape_cast %47 : vector<128xf32> to vector<1x128xf32>
    %49 = math.log %45 : vector<1x128xf32>
    %50 = tpu.reciprocal %45 {approx = true} : vector<1x128xf32> -> vector<1x128xf32>
    %51 = arith.mulf %48, %50 : vector<1x128xf32>
    %52 = arith.subf %49, %51 : vector<1x128xf32>
    %cst_18 = arith.constant dense<0.000000e+00> : vector<1xf32>
    %53 = vector.multi_reduction <add>, %52, %cst_18 [1] : vector<1x128xf32> to vector<1xf32>
    %54 = vector.shape_cast %53 : vector<1xf32> to vector<1x1xf32>
    %cst_19 = arith.constant 1.280000e+02 : f32
    %55 = vector.broadcast %cst_19 : f32 to vector<1x1xf32>
    %56 = arith.divf %54, %55 : vector<1x1xf32>
    %cst_20 = arith.constant 1.000000e+00 : f32
    %57 = vector.broadcast %cst_20 : f32 to vector<1x1xf32>
    %58 = arith.divf %57, %56 : vector<1x1xf32>
    %c2_21 = arith.constant 2 : index
    %59 = memref.load %arg0[%c2_21] : memref<3xf32, #tpu.memory_space<smem>>
    %c2_22 = arith.constant 2 : index
    %60 = memref.load %arg1[%c2_22] : memref<3xf32, #tpu.memory_space<smem>>
    %61 = vector.broadcast %60 : f32 to vector<1x1xf32>
    %62 = arith.mulf %61, %58 : vector<1x1xf32>
    %63 = vector.broadcast %59 : f32 to vector<1x1xf32>
    %64 = arith.addf %63, %62 : vector<1x1xf32>
    %65 = vector.broadcast %64 : vector<1x1xf32> to vector<16x128xf32>
    %66 = arith.mulf %65, %40 : vector<16x128xf32>
    %67 = arith.addf %37, %66 : vector<16x128xf32>
    %c0_23 = arith.constant 0 : index
    %c0_24 = arith.constant 0 : index
    %68 = vector.load %arg3[%c0_23, %c0_24] : memref<16x128xf32, #tpu.memory_space<vmem>>, vector<16x128xf32>
    tpu.vector_store %arg3[%c0_23, %c0_24], %67 {strides = array<i32>} : memref<16x128xf32, #tpu.memory_space<vmem>>, vector<16x128xf32>,
    return
  }
}

</mosaic_0001>

<bundles_post_ra>
// kernel: tpu_custom_call.1
= control target key start
LH: loop header
LB: loop body
LE: loop exit
PB: predicated region body
PF: predicated region fallthrough
CT: control target
= control target key end

     0   :  { %8 = vsyncpa [#allocation5], 0  ;;  %s386_s0 = inlined_call_operand.hbm [shape: f32[3], index: 0, kind: input, shape index: {}]   ;;  %s387_s1 = inlined_call_operand.vmem [shape: f32[3], index: 1, kind: input, shape index: {}]   ;;  %s388_s2 = inlined_call_operand.hbm [shape: bf16[3,16,128], index: 2, kind: input, shape index: {}]   ;;  %s389_s3 = inlined_call_operand.hbm [shape: f32[16,128], index: 3, kind: output, shape index: {}]  }
   0x1   :  { %9 = vsyncpa [#allocation6], 0 }
   0x2   :  { %10 = vsyncpa [#allocation3], 0 }
   0x3   :  { %11 = vsyncpa [#allocation4], 0  ;;  %s26_s14 = sshll.u32 %s387_s1, 4  ;;  %s221_s17 = scalar_lea.hbm %s386_s0, 16  ;;  %s27_s14 = int_to_ptr.vmem [resolvable:$true] %s26_s14 }
   0x4   :  { %p222_p0 = scmp.ne.s32.totalorder %s386_s0, %s221_s17  ;;  %p225_p1 = scmp.lt.u32.totalorder %s221_s17, %s386_s0 }
   0x6   :  { %p227_p2 = pnand %p225_p1, %p222_p0 }
   0x8   :  { %230 = shalt.err (!%p227_p2)
}
   0x9   :  { %s295_s22 = smov [#allocation2]   ;;  %s231_s1 = scalar_lea.vmem %s27_s14, 16 }
   0xa   :  { %19 = dma.hbm_to_smem %s386_s0, 16, %s295_s22, [#allocation5]  }
   0xb   :  { %p232_p3 = scmp.ne.s32.totalorder %s27_s14, %s231_s1  ;;  %p236_p4 = scmp.lt.s32.totalorder %s27_s14, %s27_s14 }
   0xc   :  { %p237_p5 = scmp.lt.s32.totalorder %s231_s1, %s231_s1 }
   0xe   :  { %p238_p6 = por %p237_p5, %p236_p4 }
  0x10   :  { %p239_p7 = pnand %p238_p6, %p232_p3 }
  0x12   :  { %242 = shalt.err (!%p239_p7)
}
  0x13   :  { %s296_s25 = smov [#allocation7]   ;;  %s297_s26 = smov [#allocation8]  }
  0x14   :  { %29 = dma.vmem_to_smem %s27_s14, 16, %s296_s25, [#allocation6]  }
  0x15   :  { %s35_s27 = sshll.u32 %s297_s26, 4  ;;  %s243_s30 = scalar_lea.hbm %s388_s2, 384  ;;  %s36_s27 = int_to_ptr.vmem [resolvable:$true] %s35_s27 }
  0x16   :  { %p244_p8 = scmp.ne.s32.totalorder %s388_s2, %s243_s30  ;;  %p247_p9 = scmp.lt.u32.totalorder %s243_s30, %s388_s2 }
  0x18   :  { %p249_p10 = pnand %p247_p9, %p244_p8 }
  0x1a   :  { %252 = shalt.err (!%p249_p10)
}
  0x1b   :  { %s253_s7 = scalar_lea.vmem %s36_s27, 384  ;;  %p258_p12 = scmp.lt.s32.totalorder %s36_s27, %s36_s27 }
  0x1c   :  { %p254_p11 = scmp.ne.s32.totalorder %s36_s27, %s253_s7  ;;  %p259_p13 = scmp.lt.s32.totalorder %s253_s7, %s253_s7 }
  0x1e   :  { %p260_p0 = por %p259_p13, %p258_p12 }
  0x20   :  { %p261_p1 = pnand %p260_p0, %p254_p11 }
  0x22   :  { %264 = shalt.err (!%p261_p1)
}
  0x23   :  { %s298_s8 = smov 64   ;;  %s299_s9 = smov 4  }
  0x24   :  { %41 = dma.hbm_to_vmem [thread:$0]  %s388_s2, 384, %s36_s27, [#allocation3], %s298_s8, %s298_s8, %s299_s9  }
  0x25   :  { %287 = dma.done.wait [#allocation5], 16  }
  0x26   :  { %288 = vsyncadd [#allocation5], 4294967280 }
  0x27   :  { %289 = dma.done.wait [#allocation6], 16  }
  0x28   :  { %290 = vsyncadd [#allocation6], 4294967280 }
  0x29   :  { %291 = dma.done.wait [#allocation3], 384  }
  0x2a   :  { %292 = vsyncadd [#allocation3], 4294966912 }
  0x2b   :  { %51 = sfence }
  0x2c   :  { %v182_v0 = vld [vmem:[#allocation8] sm:$0xff]   ;;  %v190_v1 = vld [vmem:[#allocation8 + $0x10] sm:$0xff]   ;;  %s90_s2 = sld [smem:[#allocation7]]  ;;  %s178_s13 = sld [smem:[#allocation2 + $0x1]] }
  0x2d   :  { %v350_v2 = vunpack.c.l.bf16 %v182_v0  ;;  %v352_v3 = vunpack.c.h.bf16 %v182_v0  ;;  %v354_v4 = vunpack.c.l.bf16 %v190_v1  ;;  %v356_v5 = vunpack.c.h.bf16 %v190_v1  ;;  %s89_s12 = sld [smem:[#allocation2]]  ;;  %s180_s14 = sld [smem:[#allocation7 + $0x2]]  ;;  %v186_v0 = vld [vmem:[#allocation8 + $0x8] sm:$0xff]  }
  0x2e   :  { %s179_s15 = sld [smem:[#allocation2 + $0x2]]  ;;  %s300_s16 = smov [#allocation9]  }
  0x2f   :  { %v56_v6 = vmax.f32 %v350_v2, 1e-30  ;;  %v57_v7 = vmax.f32 %v352_v3, 1e-30  ;;  %v62_v8 = vadd.f32 %v352_v3, %v350_v2  ;;  %v115_v9 = vmax.f32 %v354_v4, 1e-30 }
  0x30   :  { %v116_v10 = vmax.f32 %v356_v5, 1e-30  ;;  %v121_v11 = vadd.f32 %v356_v5, %v354_v4  ;;  %s164_s17 = sshll.u32 %s300_s16, 4  ;;  %s165_s17 = int_to_ptr.vmem [resolvable:$true] %s164_s17 }
  0x31   :  { %201 = vlog2.f32 %v56_v6  ;;  %v63_v12 = vrot.slane %v62_v8, 4  ;;  %s265_s18 = scalar_lea.vmem %s165_s17, 256  ;;  %p270_p3 = scmp.lt.s32.totalorder %s165_s17, %s165_s17 }
  0x32   :  { %203 = vlog2.f32 %v57_v7  ;;  %v122_v13 = vrot.slane %v121_v11, 4  ;;  %v91_v1 = vstv %s90_s2  ;;  %p266_p2 = scmp.ne.s32.totalorder %s165_s17, %s265_s18  ;;  %p271_p4 = scmp.lt.s32.totalorder %s265_s18, %s265_s18 }
  0x33   :  { %v64_v14 = vadd.f32 %v63_v12, %v62_v8  ;;  %205 = vlog2.f32 %v115_v9  ;;  %v93_v7 = vstv %s89_s12  ;;  %v187_v8 = vunpack.c.l.bf16 %v186_v0 }
  0x34   :  { %207 = vlog2.f32 %v116_v10  ;;  %v123_v15 = vadd.f32 %v122_v13, %v121_v11  ;;  %v188_v10 = vunpack.c.h.bf16 %v186_v0  ;;  %v105_v11 = vstv %s178_s13  ;;  %p272_p5 = por %p271_p4, %p270_p3 }
  0x35   :  { %v65_v16 = vrot.slane %v64_v14, 2  ;;  %v149_v12 = vstv %s180_s14 }
  0x36   :  { %v124_v17 = vrot.slane %v123_v15, 2  ;;  %p273_p6 = pnand %p272_p5, %p266_p2 }
  0x37   :  { %v66_v18 = vadd.f32 %v65_v16, %v64_v14  ;;  %v151_v16 = vstv %s179_s15 }
  0x38   :  { %v125_v19 = vadd.f32 %v124_v17, %v123_v15  ;;  %v106_v15 = vmul.f32 %v187_v8, %v105_v11 }
  0x39   :  { %v67_v20 = vrot.slane %v66_v18, 1 }
  0x3a   :  { %v126_v21 = vrot.slane %v125_v19, 1 }
  0x3b   :  { %v202_v22 = vpop.eup %201  ;;  %v68_v25 = vadd.f32 %v67_v20, %v66_v18  ;;  %v107_v20 = vmul.f32 %v188_v10, %v105_v11 }
  0x3c   :  { %v204_v23 = vpop.eup %203  ;;  %v59_v24 = vmul.f32 0.6931472, %v202_v22  ;;  %v127_v31 = vadd.f32 %v126_v21, %v125_v19 }
  0x3d   :  { %v206_v26 = vpop.eup %205  ;;  %v61_v27 = vmul.f32 0.6931472, %v204_v23  ;;  %209 = vlog2.f32 %v68_v25 }
  0x3e   :  { %v208_v28 = vpop.eup %207  ;;  %v69_v29 = vmul.f32 %v350_v2, %v59_v24  ;;  %v118_v30 = vmul.f32 0.6931472, %v206_v26  ;;  %211 = vrcp.f32 %v68_v25 }
  0x3f   :  { %v70_v32 = vmul.f32 %v352_v3, %v61_v27  ;;  %v120_v33 = vmul.f32 0.6931472, %v208_v28  ;;  %213 = vlog2.f32 %v127_v31 }
  0x40   :  { %v128_v34 = vmul.f32 %v354_v4, %v118_v30  ;;  %215 = vrcp.f32 %v127_v31 }
  0x41   :  { %v71_v35 = vadd.f32 %v70_v32, %v69_v29  ;;  %v129_v36 = vmul.f32 %v356_v5, %v120_v33 }
  0x43   :  { %v72_v37 = vrot.slane %v71_v35, 4  ;;  %v130_v38 = vadd.f32 %v129_v36, %v128_v34 }
  0x45   :  { %v73_v39 = vadd.f32 %v72_v37, %v71_v35  ;;  %v131_v40 = vrot.slane %v130_v38, 4 }
  0x47   :  { %v74_v41 = vrot.slane %v73_v39, 2  ;;  %v132_v42 = vadd.f32 %v131_v40, %v130_v38  ;;  %v210_v45 = vpop.eup %209 }
  0x48   :  { %v212_v46 = vpop.eup %211  ;;  %v79_v51 = vmul.f32 0.6931472, %v210_v45 }
  0x49   :  { %v75_v43 = vadd.f32 %v74_v41, %v73_v39  ;;  %v133_v44 = vrot.slane %v132_v42, 2  ;;  %v214_v49 = vpop.eup %213 }
  0x4a   :  { %v216_v53 = vpop.eup %215  ;;  %v138_v56 = vmul.f32 0.6931472, %v214_v49 }
  0x4b   :  { %v76_v47 = vrot.slane %v75_v43, 1  ;;  %v134_v48 = vadd.f32 %v133_v44, %v132_v42 }
  0x4d   :  { %v77_v50 = vadd.f32 %v76_v47, %v75_v43  ;;  %v135_v52 = vrot.slane %v134_v48, 1 }
  0x4f   :  { %v81_v54 = vmul.f32 %v212_v46, %v77_v50  ;;  %v136_v55 = vadd.f32 %v135_v52, %v134_v48 }
  0x51   :  { %v82_v57 = vsub.f32 %v79_v51, %v81_v54  ;;  %v140_v58 = vmul.f32 %v216_v53, %v136_v55 }
  0x53   :  { %83 = vadd.xlane.f32.xlu0 %v82_v57  ;;  %v141_v59 = vsub.f32 %v138_v56, %v140_v58 }
  0x57   :  { %142 = vadd.xlane.f32.xlu0 %v141_v59 }
  0xe0   :  { %v84_v60 = vpop.xlane.xlu0 %83 }
  0xe1   :  { %v86_v61 = vmul.f32 0.0078125, %v84_v60 }
  0xe3   :  { %217 = vrcp.f32 %v86_v61 }
  0xe4   :  { %v143_v62 = vpop.xlane.xlu0 %142 }
  0xe5   :  { %v144_v63 = vmul.f32 0.0078125, %v143_v62 }
  0xe7   :  { %219 = vrcp.f32 %v144_v63 }
  0xed   :  { %v218_v6 = vpop.eup %217 }
  0xee   :  { %v92_v9 = vmul.f32 %v218_v6, %v91_v1 }
  0xf0   :  { %v94_v13 = vadd.f32 %v93_v7, %v92_v9 }
  0xf1   :  { %v220_v14 = vpop.eup %219 }
  0xf2   :  { %v150_v17 = vmul.f32 %v220_v14, %v149_v12  ;;  %v95_v18 = vmul.f32 %v350_v2, %v94_v13  ;;  %v96_v19 = vmul.f32 %v352_v3, %v94_v13 }
  0xf4   :  { %v152_v21 = vadd.f32 %v151_v16, %v150_v17  ;;  %v108_v22 = vadd.f32 %v106_v15, %v95_v18  ;;  %v109_v23 = vadd.f32 %v107_v20, %v96_v19 }
  0xf6   :  { %v153_v24 = vmul.f32 %v354_v4, %v152_v21  ;;  %v154_v25 = vmul.f32 %v356_v5, %v152_v21 }
  0xf8   :  { %v155_v26 = vadd.f32 %v153_v24, %v108_v22  ;;  %v156_v27 = vadd.f32 %v154_v25, %v109_v23 }
  0xfa   :  { %157 = vst [vmem:[#allocation9] sm:$0xff] %v155_v26  ;;  %158 = vst [vmem:[#allocation9 + $0x8] sm:$0xff] %v156_v27 }
  0xfb   :  { %276 = shalt.err (!%p273_p6)
}
  0xfc   :  { %s277_s21 = scalar_lea.hbm %s389_s3, 256 }
  0xfd   :  { %p278_p7 = scmp.ne.s32.totalorder %s389_s3, %s277_s21  ;;  %p281_p8 = scmp.lt.u32.totalorder %s277_s21, %s389_s3 }
  0xff   :  { %p283_p9 = pnand %p281_p8, %p278_p7 }
 0x101   :  { %286 = shalt.err (!%p283_p9)
}
 0x102   :  { %s301_s25 = smov 128   ;;  %s302_s26 = smov 8  }
 0x103   :  { %170 = dma.vmem_to_hbm [thread:$0]  %s165_s17, 256, %s389_s3, [#allocation4], %s301_s25, %s301_s25, %s302_s26  }
 0x104   :  { %293 = dma.done.wait [#allocation4], 256  }
 0x105   :  { %294 = vsyncadd [#allocation4], 4294967040 }
 0x106   :  { %174 = vsyncpa [#allocation3], 1 }
 0x107   :  { %175 = vsyncpa [#allocation4], 1 }
 0x108   :  { %176 = vsyncpa [#allocation5], 1 }
 0x109   :  { %177 = vsyncpa [#allocation6], 1 }

</bundles_post_ra>
